<compile_context>
chip_gen: v7x
topology: tpu7x:2x2x1
jax: 0.10.0
libtpu: 0.0.40
codegen_flags: <defaults>
</compile_context>

<pallas_src>
import math
import functools

import jax
import jax.numpy as jnp
from jax.experimental import pallas as pl
from jax.experimental.pallas import tpu as pltpu


def _equal_conv2d_kernel(x_ref, w_ref, b_ref, o_ref, *, K, tile_h, Wo):
    """One grid step = (batch n, output-row tile r).

    x_ref : (1, Hp, Wp, Cin)        full padded image (bf16), revisited across r
    w_ref : (K*K*Cin, Cpad)         folded + EqualLR-scaled weights (bf16)
    b_ref : (1, Cpad)               bias (f32)
    o_ref : (1, tile_h, Wo, Cpad)   lane-dense output tile (f32)
    """
    r = pl.program_id(1)
    row0 = pl.multiple_of(r * tile_h, tile_h)

    # In-kernel im2col: gather the K*K taps of this halo'd row window and fold
    # them into a single contraction axis of length K*K*Cin.
    taps = []
    for kh in range(K):
        rows = x_ref[0, pl.ds(row0 + kh, tile_h), :, :]      # (tile_h, Wp, Cin)
        for kw in range(K):
            taps.append(rows[:, kw:kw + Wo, :])              # (tile_h, Wo, Cin)
    patch = jnp.concatenate(taps, axis=-1)                   # (tile_h, Wo, K*K*Cin)

    # One MXU contraction: bf16 x bf16 -> f32 accumulate, 128-lane-dense result.
    acc = jax.lax.dot_general(
        patch, w_ref[...],
        dimension_numbers=(((2,), (0,)), ((), ())),
        preferred_element_type=jnp.float32)                  # (tile_h, Wo, Cpad)

    o_ref[0] = (acc + b_ref[...]).astype(o_ref.dtype)


def _pick_tile_h(Ho, Wo):
    # Target a few hundred flattened output rows per tile; tile_h must divide
    # Ho.  Prefer >=2 row tiles so the pipeline overlaps and both TCs get work.
    tile_h = max(1, min(Ho, 512 // max(1, Wo)))
    while Ho % tile_h:
        tile_h -= 1
    if tile_h == Ho and Ho > 1 and Ho % 2 == 0:
        tile_h = Ho // 2
    return tile_h


def equal_conv2d(x_nchw, weight_oikk, bias, *, padding=1, tile_h=None):
    """EqualConv2d forward. x_nchw: [N, Cin, H, W] f32 -> [N, Cout, Ho, Wo] f32."""
    N, Cin, H, W = x_nchw.shape
    Cout, Cin_w, K, Kw = weight_oikk.shape
    assert Cin == Cin_w and K == Kw

    # EqualLR pre-hook: scale the raw weight by sqrt(2 / fan_in).
    fan_in = Cin * K * K
    scale = math.sqrt(2.0 / fan_in)

    Hp, Wp = H + 2 * padding, W + 2 * padding
    Ho, Wo = Hp - K + 1, Wp - K + 1
    Cpad = ((Cout + 127) // 128) * 128          # lane-dense output channels
    KKC = K * K * Cin

    if tile_h is None:
        tile_h = _pick_tile_h(Ho, Wo)
    assert Ho % tile_h == 0

    # --- wrapper glue: layout + EqualLR scale, bf16 for HBM/MXU efficiency ---
    x_nhwc = jnp.transpose(x_nchw, (0, 2, 3, 1)).astype(jnp.bfloat16)
    x_pad = jnp.pad(
        x_nhwc, ((0, 0), (padding, padding), (padding, padding), (0, 0)))
    # TODO(synk): fold the spatial pad + NCHW<->NHWC transposes into the kernel
    # (masked boundary taps) to drop this extra wrapper-side HBM pass.

    w_scaled = weight_oikk.astype(jnp.float32) * scale
    w_mat = jnp.transpose(w_scaled, (2, 3, 1, 0)).reshape(KKC, Cout)  # (kh,kw,ci) x co
    w_mat = jnp.pad(w_mat, ((0, 0), (0, Cpad - Cout))).astype(jnp.bfloat16)
    b_pad = jnp.pad(bias.astype(jnp.float32), (0, Cpad - Cout)).reshape(1, Cpad)

    kernel = functools.partial(_equal_conv2d_kernel, K=K, tile_h=tile_h, Wo=Wo)

    flops = 2 * N * Ho * Wo * Cpad * KKC
    bytes_accessed = (N * Hp * Wp * Cin * 2 + KKC * Cpad * 2 + Cpad * 4
                      + N * Ho * Wo * Cpad * 4)

    out_nhwc = pl.pallas_call(
        kernel,
        out_shape=jax.ShapeDtypeStruct((N, Ho, Wo, Cpad), jnp.float32),
        grid_spec=pltpu.PrefetchScalarGridSpec(
            num_scalar_prefetch=0,
            grid=(N, Ho // tile_h),
            in_specs=[
                pl.BlockSpec((1, Hp, Wp, Cin), lambda n, r: (n, 0, 0, 0)),
                pl.BlockSpec((KKC, Cpad), lambda n, r: (0, 0)),
                pl.BlockSpec((1, Cpad), lambda n, r: (0, 0)),
            ],
            out_specs=pl.BlockSpec((1, tile_h, Wo, Cpad),
                                   lambda n, r: (n, r, 0, 0)),
        ),
        compiler_params=pltpu.CompilerParams(
            dimension_semantics=("parallel", "parallel"),
            vmem_limit_bytes=64 * 1024 * 1024),
        cost_estimate=pl.CostEstimate(
            flops=flops, transcendentals=0, bytes_accessed=bytes_accessed),
    )(x_pad, w_mat, b_pad)

    out = out_nhwc[..., :Cout]                       # drop channel padding
    return jnp.transpose(out, (0, 3, 1, 2))          # NHWC -> NCHW


def _reference(x_nchw, weight_oikk, bias, *, padding=1, cast_bf16=True):
    """XLA conv reference. cast_bf16=True matches the kernel's bf16-in/f32-acc."""
    fan_in = weight_oikk.shape[1] * weight_oikk.shape[2] * weight_oikk.shape[3]
    w = weight_oikk.astype(jnp.float32) * math.sqrt(2.0 / fan_in)
    if cast_bf16:
        xr, wr = x_nchw.astype(jnp.bfloat16), w.astype(jnp.bfloat16)
    else:
        xr, wr = x_nchw.astype(jnp.float32), w
    out = jax.lax.conv_general_dilated(
        xr, wr, window_strides=(1, 1),
        padding=((padding, padding), (padding, padding)),
        dimension_numbers=("NCHW", "OIHW", "NCHW"),
        preferred_element_type=jnp.float32)
    return out + bias.astype(jnp.float32)[None, :, None, None]


if __name__ == "__main__":
    # EqualConv2d(in_channels=4, out_channels=8, kernel_size=3, padding=1)
    N, Cin, H, W = 2, 4, 16, 16
    Cout, K, padding = 8, 3, 1

    key = jax.random.PRNGKey(0)
    kx, kw = jax.random.split(key)
    x = jax.random.normal(kx, (N, Cin, H, W), dtype=jnp.float32)
    # conv.weight.data.normal_() ; conv.bias.data.zero_()
    weight = jax.random.normal(kw, (Cout, Cin, K, K), dtype=jnp.float32)
    bias = jnp.zeros((Cout,), dtype=jnp.float32)

    out = jax.block_until_ready(equal_conv2d(x, weight, bias, padding=padding))

    assert out.shape == (N, Cout, H, W), out.shape
    assert out.dtype == jnp.float32

    # Exact check vs. an equivalently-rounded (bf16 in / f32 accum) XLA conv.
    ref_bf16 = _reference(x, weight, bias, padding=padding, cast_bf16=True)
    assert jnp.allclose(out, ref_bf16, atol=1e-3, rtol=1e-3), \
        float(jnp.max(jnp.abs(out - ref_bf16)))

    # Sanity check vs. the full-f32 reference (bf16 rounding tolerance).
    ref_f32 = _reference(x, weight, bias, padding=padding, cast_bf16=False)
    assert jnp.allclose(out, ref_f32, atol=1e-1, rtol=5e-2), \
        float(jnp.max(jnp.abs(out - ref_f32)))

    print("KERNEL_OK")
</pallas_src>

<mosaic_0001>
module attributes {stable_mosaic.version = 11 : i64} {
  func.func @_equal_conv2d_kernel(%arg0: i32, %arg1: i32, %arg2: memref<1x18x18x4xbf16, #tpu.memory_space<vmem>>, %arg3: memref<36x128xbf16, #tpu.memory_space<vmem>>, %arg4: memref<1x128xf32, #tpu.memory_space<vmem>>, %arg5: memref<1x8x16x128xf32, #tpu.memory_space<vmem>>) attributes {dimension_semantics = [#tpu.dimension_semantics<parallel>, #tpu.dimension_semantics<parallel>], iteration_bounds = array<i64: 2, 2>, scalar_prefetch = 0 : i64, scratch_operands = 0 : i64, tpu.core_type = #tpu.core_type<tc>, window_params = [{transform_indices = @transform_0, window_bounds = array<i64: 1, 18, 18, 4>}, {pipeline_mode = #tpu.pipeline_mode<synchronous>, transform_indices = @transform_1, window_bounds = array<i64: 36, 128>}, {pipeline_mode = #tpu.pipeline_mode<synchronous>, transform_indices = @transform_2, window_bounds = array<i64: 1, 128>}, {transform_indices = @transform_3, window_bounds = array<i64: 1, 8, 16, 128>}]} {
    %c8_i32 = arith.constant 8 : i32
    %0 = arith.muli %arg1, %c8_i32 : i32
    %1 = tpu.assume_multiple %0, 8 : i32
    %c0_i32 = arith.constant 0 : i32
    %2 = arith.addi %1, %c0_i32 : i32
    %c0 = arith.constant 0 : index
    %3 = arith.index_cast %2 : i32 to index
    %c0_0 = arith.constant 0 : index
    %c0_1 = arith.constant 0 : index
    %4 = vector.load %arg2[%c0, %3, %c0_0, %c0_1] : memref<1x18x18x4xbf16, #tpu.memory_space<vmem>>, vector<1x8x18x4xbf16>
    %5 = vector.shape_cast %4 : vector<1x8x18x4xbf16> to vector<8x18x4xbf16>
    %6 = vector.extract_strided_slice %5 {offsets = [0, 0, 0], sizes = [8, 16, 4], strides = [1, 1, 1]} : vector<8x18x4xbf16> to vector<8x16x4xbf16>
    %7 = vector.extract_strided_slice %5 {offsets = [0, 1, 0], sizes = [8, 16, 4], strides = [1, 1, 1]} : vector<8x18x4xbf16> to vector<8x16x4xbf16>
    %8 = vector.extract_strided_slice %5 {offsets = [0, 2, 0], sizes = [8, 16, 4], strides = [1, 1, 1]} : vector<8x18x4xbf16> to vector<8x16x4xbf16>
    %c1_i32 = arith.constant 1 : i32
    %9 = arith.addi %1, %c1_i32 : i32
    %c0_2 = arith.constant 0 : index
    %10 = arith.index_cast %9 : i32 to index
    %c0_3 = arith.constant 0 : index
    %c0_4 = arith.constant 0 : index
    %11 = vector.load %arg2[%c0_2, %10, %c0_3, %c0_4] : memref<1x18x18x4xbf16, #tpu.memory_space<vmem>>, vector<1x8x18x4xbf16>
    %12 = vector.shape_cast %11 : vector<1x8x18x4xbf16> to vector<8x18x4xbf16>
    %13 = vector.extract_strided_slice %12 {offsets = [0, 0, 0], sizes = [8, 16, 4], strides = [1, 1, 1]} : vector<8x18x4xbf16> to vector<8x16x4xbf16>
    %14 = vector.extract_strided_slice %12 {offsets = [0, 1, 0], sizes = [8, 16, 4], strides = [1, 1, 1]} : vector<8x18x4xbf16> to vector<8x16x4xbf16>
    %15 = vector.extract_strided_slice %12 {offsets = [0, 2, 0], sizes = [8, 16, 4], strides = [1, 1, 1]} : vector<8x18x4xbf16> to vector<8x16x4xbf16>
    %c2_i32 = arith.constant 2 : i32
    %16 = arith.addi %1, %c2_i32 : i32
    %c0_5 = arith.constant 0 : index
    %17 = arith.index_cast %16 : i32 to index
    %c0_6 = arith.constant 0 : index
    %c0_7 = arith.constant 0 : index
    %18 = vector.load %arg2[%c0_5, %17, %c0_6, %c0_7] : memref<1x18x18x4xbf16, #tpu.memory_space<vmem>>, vector<1x8x18x4xbf16>
    %19 = vector.shape_cast %18 : vector<1x8x18x4xbf16> to vector<8x18x4xbf16>
    %20 = vector.extract_strided_slice %19 {offsets = [0, 0, 0], sizes = [8, 16, 4], strides = [1, 1, 1]} : vector<8x18x4xbf16> to vector<8x16x4xbf16>
    %21 = vector.extract_strided_slice %19 {offsets = [0, 1, 0], sizes = [8, 16, 4], strides = [1, 1, 1]} : vector<8x18x4xbf16> to vector<8x16x4xbf16>
    %22 = vector.extract_strided_slice %19 {offsets = [0, 2, 0], sizes = [8, 16, 4], strides = [1, 1, 1]} : vector<8x18x4xbf16> to vector<8x16x4xbf16>
    %23 = tpu.concatenate %6, %7, %8, %13, %14, %15, %20, %21, %22 in 2 : vector<8x16x4xbf16>, vector<8x16x4xbf16>, vector<8x16x4xbf16>, vector<8x16x4xbf16>, vector<8x16x4xbf16>, vector<8x16x4xbf16>, vector<8x16x4xbf16>, vector<8x16x4xbf16>, vector<8x16x4xbf16> -> vector<8x16x36xbf16>
    %c0_8 = arith.constant 0 : index
    %c0_9 = arith.constant 0 : index
    %24 = vector.load %arg3[%c0_8, %c0_9] : memref<36x128xbf16, #tpu.memory_space<vmem>>, vector<36x128xbf16>
    %cst = arith.constant dense<0.000000e+00> : vector<8x16x128xf32>
    %25 = tpu.matmul %23, %24, %cst {dimension_numbers = #tpu.dot_dimension_numbers<[2], [0], [0, 1], [1], [0, 0, 0, 1, 1, 1], [], []>} : vector<8x16x36xbf16>, vector<36x128xbf16>, vector<8x16x128xf32> -> vector<8x16x128xf32>
    %c0_10 = arith.constant 0 : index
    %c0_11 = arith.constant 0 : index
    %26 = vector.load %arg4[%c0_10, %c0_11] : memref<1x128xf32, #tpu.memory_space<vmem>>, vector<1x128xf32>
    %27 = vector.shape_cast %26 : vector<1x128xf32> to vector<1x1x128xf32>
    %28 = vector.broadcast %27 : vector<1x1x128xf32> to vector<8x16x128xf32>
    %29 = arith.addf %25, %28 : vector<8x16x128xf32>
    %c0_12 = arith.constant 0 : index
    %c0_13 = arith.constant 0 : index
    %c0_14 = arith.constant 0 : index
    %c0_15 = arith.constant 0 : index
    %30 = vector.load %arg5[%c0_12, %c0_13, %c0_14, %c0_15] : memref<1x8x16x128xf32, #tpu.memory_space<vmem>>, vector<1x8x16x128xf32>
    %31 = vector.shape_cast %30 : vector<1x8x16x128xf32> to vector<8x16x128xf32>
    %32 = vector.shape_cast %29 : vector<8x16x128xf32> to vector<1x8x16x128xf32>
    tpu.vector_store %arg5[%c0_12, %c0_13, %c0_14, %c0_15], %32 {strides = array<i32>} : memref<1x8x16x128xf32, #tpu.memory_space<vmem>>, vector<1x8x16x128xf32>,
    return
  }
  func.func @transform_0(%arg0: i32, %arg1: i32) -> (i32, i32, i32, i32) {
    %c0_i32 = arith.constant 0 : i32
    %c0_i32_0 = arith.constant 0 : i32
    %c0_i32_1 = arith.constant 0 : i32
    %c0_i32_2 = arith.constant 0 : i32
    return %arg0, %c0_i32, %c0_i32_0, %c0_i32_1 : i32, i32, i32, i32
  }
  func.func @transform_1(%arg0: i32, %arg1: i32) -> (i32, i32) {
    %c0_i32 = arith.constant 0 : i32
    %c0_i32_0 = arith.constant 0 : i32
    %c0_i32_1 = arith.constant 0 : i32
    return %c0_i32, %c0_i32_0 : i32, i32
  }
  func.func @transform_2(%arg0: i32, %arg1: i32) -> (i32, i32) {
    %c0_i32 = arith.constant 0 : i32
    %c0_i32_0 = arith.constant 0 : i32
    %c0_i32_1 = arith.constant 0 : i32
    return %c0_i32, %c0_i32_0 : i32, i32
  }
  func.func @transform_3(%arg0: i32, %arg1: i32) -> (i32, i32, i32, i32) {
    %c0_i32 = arith.constant 0 : i32
    %c0_i32_0 = arith.constant 0 : i32
    %c0_i32_1 = arith.constant 0 : i32
    return %arg0, %arg1, %c0_i32, %c0_i32_0 : i32, i32, i32, i32
  }
}

</mosaic_0001>

<bundles_post_ra>
// kernel: tpu_custom_call.1
= control target key start
LH: loop header
LB: loop body
LE: loop exit
PB: predicated region body
PF: predicated region fallthrough
CT: control target
= control target key end

     0   :  { %s2752_s0 = inlined_call_operand.hbm [shape: bf16[2,18,18,4], index: 0, kind: input, shape index: {}]   ;;  %s2753_s1 = inlined_call_operand.hbm [shape: bf16[36,128], index: 1, kind: input, shape index: {}]   ;;  %s2754_s2 = inlined_call_operand.hbm [shape: f32[1,128], index: 2, kind: input, shape index: {}]   ;;  %s2755_s3 = inlined_call_operand.hbm [shape: f32[2,16,16,128], index: 3, kind: output, shape index: {}]  }
   0x1   :  { %2767 = sst [smem:[#allocation16_spill]] %s2753_s1 }
   0x2   :  { %2768 = sst [smem:[#allocation17_spill]] %s2754_s2 }
   0x3   :  { %8 = vsyncpa [#allocation3], 0 }
   0x4   :  { %10 = vsyncpa [#allocation3 + $0x1], 0 }
   0x5   :  { %11 = vsyncpa [#allocation6], 0 }
   0x6   :  { %12 = vsyncpa [#allocation4], 0 }
   0x7   :  { %14 = vsyncpa [#allocation4 + $0x1], 0  ;;  %s2041_s12 = smov 0   ;;  %s2043_s13 = smov 0  }
   0x8   :  { %s2045_s14 = smov 0   ;;  %s2047_s15 = smov 0  }
   0x9   :  { %s2049_s16 = smov 0   ;;  %s2051_s17 = smov 0  }
   0xa   :  { %s2053_s18 = smov 0   ;;  %s2055_s19 = smov 0  }
   0xb   :  { %s2057_s20 = smov 0   ;;  %s2059_s21 = smov 0  }
   0xc   :  { %s2061_s22 = smov 0  }
   0xd LB: > { %2769 = sst [smem:[#allocation12_spill]] %s1964_s12  ;;  %s1428_s23 = sadd.s32 4294967295, %s2004_s22   ;;  %s2004_s22 = sphi %s2061_s22, %s20_s22   ;;  %s2000_s21 = sphi %s2059_s21, %s2803_s21   ;;  %s1996_s20 = sphi %s2057_s20, %s2794_s20   ;;  %s1992_s19 = sphi %s2055_s19, %s2802_s19   ;;  %s1988_s18 = sphi %s2053_s18, %s2793_s18   ;;  %s1984_s17 = sphi %s2051_s17, %s2801_s17   ;;  %s1980_s16 = sphi %s2049_s16, %s2800_s16   ;;  %s1976_s15 = sphi %s2047_s15, %s2799_s15   ;;  %s1972_s14 = sphi %s2045_s14, %s2798_s14   ;;  %s1968_s13 = sphi %s2043_s13, %s2797_s13   ;;  %s1964_s12 = sphi %s2041_s12, %s2796_s12  }
   0xe   : > { %2770 = sst [smem:[#allocation13_spill]] %s1996_s20  ;;  %s1429_s24 = sadd.s32 4294967294, %s2004_s22  }
   0xf   : > { %p52_p0 = scmp.ne.s32.totalorder %s1980_s16, %s1976_s15  ;;  %p2097_p1 = scmp.eq.s32.totalorder %s1428_s23, 0 }
  0x10   : > { %p119_p2 = scmp.ne.s32.totalorder %s1972_s14, %s1968_s13  ;;  %p120_p4 = scmp.eq.s32.totalorder %s1428_s23, 3 }
  0x11   : > { %s2771_s25 = scalar_select %p2097_p1, 1, 0 }
  0x12   : > { %p2106_p3 = por %p2097_p1, %p52_p0  ;;  %p125_p5 = scmp.ne.s32.totalorder %s1968_s13, %s1964_s12 }
  0x13   : > { %p126_p6 = scmp.eq.s32.totalorder %s1429_s24, 3  ;;  %p2112_p7 = por %p120_p4, %p119_p2 }
  0x14   : > { %s2772_s27 = scalar_select %p2106_p3, 1, 0 }
  0x15   : > { %s2773_s28 = scalar_select %p2112_p7, 1, 0 }
  0x16   : > { %p1430_p8 = scmp.ge.s32.totalorder %s2004_s22, 1  ;;  %p2117_p9 = por %p126_p6, %p125_p5 }
  0x17   : > { %p133_p10 = scmp.lt.s32.totalorder %s2004_s22, 5  ;;  %s2006_s4 = smov [#allocation5]  }
  0x18   : > { %s2774_s29 = scalar_select %p2117_p9, 1, 0 }
  0x19   : > { %p2122_p11 = pnand %p1430_p8, %p133_p10  ;;  %s145_s5 = sshll.u32 %s2006_s4, 4  ;;  %s146_s5 = int_to_ptr.vmem [resolvable:$true] %s145_s5 }
  0x1a   : > { %2775 = sst [smem:[#allocation14_spill]] %s2774_s29  ;;  %s2007_s7 = smov [#allocation7]  }
  0x1b   : > { %s2776_s30 = scalar_select %p2122_p11, 1, 0 }
  0x1c   : > { %p1619_p12 = pneg %p2122_p11  ;;  %s159_s8 = sshll.u32 %s2007_s7, 4  ;;  %s2134_s8 = int_to_ptr.vmem [resolvable:$true] %s159_s8 }
  0x1d   : > { %s2778_s1 = sld [smem:[#allocation16_spill]] }
  0x1e   : > { %p2130_p13 = pnand %p1619_p12, %p2097_p1 }
  0x20   : > { %p1794_p2 = pneg %p2130_p13 }
  0x23   : > { %s1792_s11 = scalar_lea.hbm %s2778_s1, 320 }
  0x24   : > { %p1793_p0 = scmp.ne.s32.totalorder %s2778_s1, %s1792_s11  ;;  %p1799_p6 = scmp.lt.u32.totalorder %s1792_s11, %s2778_s1 }
  0x26   : > { %p1795_p4 = pnand %p1794_p2, %p1793_p0 }
  0x28   : > { %p1796_p5 = pneg %p1795_p4 }
  0x2a   : > { %p1801_p8 = pnand %p1799_p6, %p1796_p5 }
  0x2c   : > { %1804 = shalt.err (!%p1801_p8)
}
  0x2d   : > { %s1805_s7 = scalar_lea.vmem %s146_s5, 320  ;;  %p1813_p7 = scmp.lt.s32.totalorder %s146_s5, %s146_s5 }
  0x2e   : > { %p1806_p10 = scmp.ne.s32.totalorder %s146_s5, %s1805_s7  ;;  %p1814_p1 = scmp.lt.s32.totalorder %s1805_s7, %s1805_s7 }
  0x30   : > { %p1808_p12 = pnand %p1806_p10, %p1794_p2  ;;  %p1815_p3 = por %p1814_p1, %p1813_p7 }
  0x32   : > { %p1809_p9 = pneg %p1808_p12 }
  0x34   : > { %p1816_p11 = pnand %p1815_p3, %p1809_p9 }
  0x36   : > { %1819 = shalt.err (!%p1816_p11)
}
  0x37   : > { %s2763_s9 = smov 64   ;;  %s2764_s10 = smov 4  }
  0x38   : > { %1622 = dma.hbm_to_vmem [thread:$0]  (!%p2130_p13), %s2778_s1, 320, %s146_s5, [#allocation6], %s2763_s9, %s2763_s9, %s2764_s10  }
  0x39   : > { %s2779_s2 = sld [smem:[#allocation17_spill]] }
  0x3f   : > { %s1820_s4 = scalar_lea.hbm %s2779_s2, 16 }
  0x40   : > { %p1821_p1 = scmp.ne.s32.totalorder %s2779_s2, %s1820_s4  ;;  %p1827_p9 = scmp.lt.u32.totalorder %s1820_s4, %s2779_s2 }
  0x42   : > { %p1823_p3 = pnand %p1821_p1, %p1794_p2 }
  0x44   : > { %p1824_p7 = pneg %p1823_p3 }
  0x46   : > { %p1829_p11 = pnand %p1827_p9, %p1824_p7 }
  0x48   : > { %1832 = shalt.err (!%p1829_p11)
}
  0x49   : > { %s1833_s5 = scalar_lea.vmem %s2134_s8, 16  ;;  %s1840_s26 = scalar_lea.vmem %s2134_s8, 32 }
  0x4a   : > { %p1834_p0 = scmp.ne.s32.totalorder %s2134_s8, %s1833_s5  ;;  %p1841_p6 = scmp.lt.s32.totalorder %s2134_s8, %s2134_s8 }
  0x4b   : > { %p1842_p8 = scmp.lt.s32.totalorder %s1840_s26, %s1833_s5 }
  0x4c   : > { %p1836_p4 = pnand %p1834_p0, %p1794_p2 }
  0x4d   : > { %p1843_p10 = por %p1842_p8, %p1841_p6 }
  0x4e   : > { %p1837_p5 = pneg %p1836_p4 }
  0x50   : > { %p1844_p12 = pnand %p1843_p10, %p1837_p5 }
  0x52   : > { %1847 = shalt.err (!%p1844_p12)
}
  0x53   : > { %1625 = dma.hbm_to_vmem [thread:$0]  (!%p2130_p13), %s2779_s2, 16, %s2134_s8, [#allocation6]  }
  0x54   : > { %s29_s11 = sadd.s32 1, %s1996_s20  ;;  %s32_s15 = sadd.s32 1, %s2000_s21 }
  0x55   : > { %p30_p2 = scmp.ge.s32.totalorder %s29_s11, 2  ;;  %s39_s6 = sadd.s32 1, %s1984_s17 }
  0x56   : > { %p46_p1 = scmp.ne.s32.totalorder %s1984_s17, %s1980_s16  ;;  %p47_p3 = scmp.eq.s32.totalorder %s2004_s22, 0 }
  0x57   : > { %s2805_s11 = smov (%p30_p2, %s29_s11), 0  ;;  %s2807_s15 = smov (!%p30_p2, %s32_s15), %s2000_s21 }
  0x58   : > { %2780 = sst [smem:[#allocation15_spill]] %s2805_s11  ;;  %p2196_p7 = por %p47_p3, %p46_p1 }
  0x59   : > { %s105_s24 = ssub.s32 %s1996_s20, %s2805_s11  ;;  %p34_p13 = scmp.ge.s32.totalorder %s2807_s15, 2 }
  0x5a   : > { %p1636_p9 = scmp.lt.s32.totalorder %s2004_s22, 4  ;;  %s170_s8 = sand.u32 1, %s1984_s17  }
  0x5b   : > { %s1605_s4 = smul.u32 3456, %s2000_s21  ;;  %s2809_s15 = smov (%p34_p13, %s2807_s15), 0 }
  0x5c   : > { %s1604_s7 = smul.u32 216, %s170_s8  ;;  %s36_s5 = ssub.s32 %s2000_s21, %s2809_s15 }
  0x5d   : > { %s2212_s29 = scalar_lea.hbm %s2752_s0, %s1605_s4  ;;  %p37_p11 = scmp.eq.s32.totalorder %s36_s5, 0 }
  0x5e   : > { %s106_s9 = sor.u32 %s105_s24, %s36_s5  ;;  %s2782_s1 = sadd.s32 1, %s1972_s14 }
  0x5f   : > { %p107_p0 = scmp.eq.s32.totalorder %s106_s9, 0  ;;  %s174_s11 = scalar_lea.vmem [#allocation2], %s1604_s7 }
  0x60   : > { %s2215_s10 = scalar_select %p37_p11, %s1984_s17, %s39_s6  }
  0x61   : > { %s2220_s2 = scalar_select %p107_p0, %s1972_s14, %s2782_s1  }
  0x62   : > { %s181_s20 = sshll.u32 %s174_s11, 4  ;;  %p2226_p4 = pnand %p1636_p9, %p2196_p7  ;;  %s2230_s20 = int_to_ptr.vmem [resolvable:$true] %s181_s20 }
  0x63   : > { %s2232_s24 = scalar_lea.sflag [#allocation3], %s170_s8  ;;  %s1848_s9 = scalar_lea.hbm %s2212_s29, 3456 }
  0x64   : > { %p1849_p5 = scmp.ne.s32.totalorder %s2212_s29, %s1848_s9  ;;  %p1850_p6 = pneg %p2226_p4 }
  0x65   : > { %s1853_s6 = scalar_lea.hbm %s2752_s0, 6912  ;;  %p1854_p12 = scmp.lt.u32.totalorder %s2212_s29, %s2752_s0 }
  0x66   : > { %p1851_p8 = pnand %p1850_p6, %p1849_p5  ;;  %p1855_p2 = scmp.lt.u32.totalorder %s1853_s6, %s1848_s9 }
  0x67   : > { %p1857_p3 = scmp.lt.u32.totalorder %s1848_s9, %s2212_s29 }
  0x68   : > { %p1852_p10 = pneg %p1851_p8  ;;  %p1856_p1 = por %p1855_p2, %p1854_p12 }
  0x6a   : > { %p1858_p7 = por %p1857_p3, %p1856_p1 }
  0x6c   : > { %p1859_p13 = pnand %p1858_p7, %p1852_p10 }
  0x6e   : > { %1862 = shalt.err (!%p1859_p13)
}
  0x6f   : > { %s1863_s8 = scalar_lea.vmem %s2230_s20, 3456  ;;  %s2010_s7 = smov [#allocation2]  }
  0x70   : > { %p1864_p9 = scmp.ne.s32.totalorder %s2230_s20, %s1863_s8  ;;  %s1868_s5 = sshll.u32 %s2010_s7, 4  ;;  %s1869_s5 = int_to_ptr.vmem [resolvable:$false] %s1868_s5 }
  0x71   : > { %s1870_s12 = scalar_lea.vmem %s1869_s5, 6912  ;;  %p1871_p5 = scmp.lt.s32.totalorder %s2230_s20, %s1869_s5 }
  0x72   : > { %p1866_p11 = pnand %p1864_p9, %p1850_p6  ;;  %p1872_p8 = scmp.lt.s32.totalorder %s1870_s12, %s1863_s8 }
  0x74   : > { %p1867_p0 = pneg %p1866_p11  ;;  %p1873_p12 = por %p1872_p8, %p1871_p5 }
  0x76   : > { %p1874_p2 = pnand %p1873_p12, %p1867_p0 }
  0x78   : > { %1877 = shalt.err (!%p1874_p2)
}
  0x79   : > { %s2784_s9 = smov 4   ;;  %s2785_s1 = smov 64  }
  0x7a   : > { %1629 = dma.hbm_to_vmem [thread:$0]  (!%p2226_p4), %s2212_s29, 3456, %s2230_s20, %s2232_s24, %s2785_s1, %s2785_s1, %s2784_s9  }
  0x7b   : > { %p2786_p6 = scmp.ne.s32.totalorder %s2776_s30, 0 }
  0x7c   : > { %s195_s11 = sand.u32 (!%p2786_p6), 1, %s1980_s16   ;;  %p2787_p10 = scmp.ne.s32.totalorder (!%p2786_p6), %s2772_s27, 0 }
  0x7d   : > { %193 = sbr.rel (%p2786_p6) target bundleno = 613 (0x265), region = 32  ;;  %s196_s23 = scalar_lea.sflag (!%p2786_p6), [#allocation3], %s195_s11 }
  0x7e   : > { %s1606_s6 = smul.u32 (!%p2786_p6), 216, %s195_s11 }
  0x80   : > { %s199_s4 = scalar_lea.vmem (!%p2786_p6), [#allocation2], %s1606_s6 }
  0x84   : > { %1951 = dma.done.wait (%p2787_p10), %s196_s23, 3456  }
  0x85   : > { %1953 = vsyncadd (%p2787_p10), %s196_s23, 4294963840  ;;  %p2788_p1 = scmp.ne.s32.totalorder %s2771_s25, 0 }
  0x87   : > { %1955 = dma.done.wait (%p2788_p1), [#allocation6], 336  }
  0x88   : > { %1957 = vsyncadd (%p2788_p1), [#allocation6], 4294966960  ;;  %s1561_s20 = smul.u32 96, %s1988_s18  ;;  %vm493_vm0 = vcmask 1046528   ;;  %s2011_s27 = smov 12   ;;  %vm1178_vm2 = vcmask 1041408  }
  0x89   : > { %vm380_vm1 = vsmask.f32 7424  ;;  %s2012_s25 = smov 8   ;;  %s2013_s29 = smov 4   ;;  %vm998_vm3 = vcmask 31744   ;;  %vm1015_vm4 = vcmask 64512  }
  0x8a   : > { %s2275_s30 = scalar_lea.vmem %s199_s4, %s1561_s20 [#allocation2]  ;;  %s2014_s26 = smov 16   ;;  %vm1032_vm5 = vcmask 97280   ;;  %vm1049_vm6 = vcmask 130048   ;;  %vm1066_vm7 = vcmask 162816   ;;  %vm1083_vm8 = vcmask 195584  }
  0x8b   : > { %v2278_v0 = vld [vmem:[%s2275_s30 + $0x3c] sm:$0xff]   ;;  %v2281_v1 = vld [vmem:[%s2275_s30 + $0xc] sm:$0xff]   ;;  %v1744_v3 = vld [vmem:[%s2275_s30 + $0x38] ss:$0 sps:$4 sm:$0x11]   ;;  %s2015_s24 = smov 20  }
  0x8c   : > { %582 = vrot.lane.b32.xlu1 %v2278_v0, %s2011_s27  ;;  %574 = vrot.lane.b32.xlu0 %v2281_v1, %s2011_s27  ;;  %v2288_v2 = vld [vmem:[%s2275_s30 + $0x30] sm:$0xff]   ;;  %v2292_v4 = vld [vmem:[%s2275_s30] sm:$0xff]   ;;  %v663_v5 = vshrl.u32 %v2278_v0, 16  ;;  %v507_v7 = vrot.slane %v1744_v3, 1  ;;  %v437_v43 = vshll.u32 %v1744_v3, 16  ;;  %v665_v48 = vshll.u32 %v2278_v0, 16 }
  0x8d   : > { %v506_v6 = vrot.slane %v2288_v2, 1  ;;  %v1746_v8 = vld [vmem:[%s2275_s30 + $0x8] ss:$0 sps:$4 sm:$0x11]   ;;  %v2298_v9 = vld [vmem:[%s2275_s30 + $0x3c] sm:$0xff]   ;;  %v494_v10 = vrot.slane %v2292_v4, 1 }
  0x8e   : > { %v2302_v11 = vld [vmem:[%s2275_s30 + $0xc] sm:$0xff]   ;;  %v495_v13 = vrot.slane %v1746_v8, 1  ;;  %v1748_v14 = vld [vmem:[%s2275_s30 + $0x44] ss:$0 sps:$4 sm:$0x11]   ;;  %v509_v15 = vrot.slane %v2298_v9, 1 }
  0x8f   : > { %v508_v12 = vsel %vm493_vm0, %v506_v6, %v507_v7  ;;  %v497_v16 = vrot.slane %v2302_v11, 1  ;;  %v510_v18 = vrot.slane %v1748_v14, 1  ;;  %v1750_v19 = vld [vmem:[%s2275_s30 + $0x14] ss:$0 sps:$4 sm:$0x11]   ;;  %v394_v20 = vshrl.u32 %v2302_v11, 16 }
  0x90   : > { %526 = vrot.lane.b32.xlu1 %v508_v12, %s2012_s25  ;;  %v496_v17 = vsel %vm493_vm0, %v494_v10, %v495_v13  ;;  %v396_v21 = vshll.u32 %v2302_v11, 16  ;;  %v382_v22 = vshrl.u32 %v2292_v4, 16  ;;  %v384_v23 = vshll.u32 %v2292_v4, 16  ;;  %v2322_v36 = vld [vmem:[%s2275_s30 + $0x48] sm:$0xff]   ;;  %v2334_v52 = vld [vmem:[%s2275_s30 + $0x18] sm:$0xff]   ;;  %s2016_s8 = smov 24  }
  0x91   : > { %518 = vrot.lane.b32.xlu0 %v496_v17, %s2012_s25  ;;  %v511_v24 = vsel %vm493_vm0, %v509_v15, %v510_v18  ;;  %v498_v25 = vrot.slane %v1750_v19, 1  ;;  %v401_v26 = vshll.u32 %v1750_v19, 16  ;;  %v389_v27 = vshll.u32 %v1746_v8, 16  ;;  %v1753_v44 = vld [vmem:[%s2275_s30 + $0x44] ss:$0 sps:$4 sm:$0x11]  }
  0x92   : > { %v398_v28 = vrot.slane %v396_v21, 1  ;;  %v386_v29 = vrot.slane %v384_v23, 1  ;;  %v442_v30 = vshrl.u32 %v2298_v9, 16  ;;  %v444_v31 = vshll.u32 %v2298_v9, 16  ;;  %s2017_s7 = smov 28   ;;  %s2018_s5 = smov 32  }
  0x93   : > { %v499_v32 = vsel %vm493_vm0, %v497_v16, %v498_v25  ;;  %v403_v33 = vrot.slane %v401_v26, 1  ;;  %v391_v34 = vrot.slane %v389_v27, 1  ;;  %v449_v35 = vshll.u32 %v1748_v14, 16  ;;  %v1754_v49 = vld [vmem:[%s2275_s30 + $0x14] ss:$0 sps:$4 sm:$0x11]  }
  0x94   : > { %528 = vrot.lane.b32.xlu1 %v511_v24, %s2012_s25  ;;  %v399_v37 = vor.u32 %v398_v28, %v394_v20  ;;  %v387_v38 = vor.u32 %v386_v29, %v382_v22  ;;  %v446_v39 = vrot.slane %v444_v31, 1  ;;  %v430_v40 = vshrl.u32 %v2288_v2, 16  ;;  %v1755_v58 = vld [vmem:[%s2275_s30 + $0x50] ss:$0 sps:$4 sm:$0x11]   ;;  %s227_s12 = sand.u32 1, %s1968_s13  }
  0x95   : > { %520 = vrot.lane.b32.xlu0 %v499_v32, %s2012_s25  ;;  %v451_v41 = vrot.slane %v449_v35, 1  ;;  %v432_v42 = vshll.u32 %v2288_v2, 16  ;;  %v439_v51 = vrot.slane %v437_v43, 1  ;;  %v670_v53 = vshll.u32 %v1753_v44, 16  ;;  %s1438_s9 = sshll.u32 %s227_s12, 7  ;;  %s1562_s11 = sshll.u32 %s1988_s18, 4 }
  0x96   : > { %v404_v45 = vsel %vm380_vm1, %v399_v37, %v403_v33  ;;  %v392_v46 = vsel %vm380_vm1, %v387_v38, %v391_v34  ;;  %v447_v47 = vor.u32 %v446_v39, %v442_v30  ;;  %v667_v55 = vrot.slane %v665_v48, 1  ;;  %v1756_v62 = vld [vmem:[%s2275_s30 + $0x20] ss:$0 sps:$4 sm:$0x11]   ;;  %v2364_v30 = vld [vmem:[%s2275_s30 + $0x48] sm:$0xff]   ;;  %v2379_v38 = vld [vmem:[%s2275_s30 + $0x54] sm:$0xff]  }
  0x97   : > { %v434_v50 = vrot.slane %v432_v42, 1  ;;  %v617_v56 = vshll.u32 %v2281_v1, 16  ;;  %v622_v57 = vshll.u32 %v1754_v49, 16  ;;  %v615_v60 = vshrl.u32 %v2281_v1, 16  ;;  %s2660_s1 = scalar_lea.vmem [#allocation8], %s1438_s9  ;;  %s1557_s6 = sshll.u32 %s1992_s19, 5 }
  0x98   : > { %479 = vrot.lane.b32.xlu1 %v404_v45, %s2013_s29  ;;  %v452_v54 = vsel %vm380_vm1, %v447_v47, %v451_v41  ;;  %v677_v61 = vshll.u32 %v2322_v36, 16  ;;  %v672_v63 = vrot.slane %v670_v53, 1  ;;  %v675_v8 = vshrl.u32 %v2322_v36, 16  ;;  %v2376_v37 = vld [vmem:[%s2275_s30 + $0x50] ss:$0 sps:$4 sm:$0x11]   ;;  %s1309_s23 = sadd.s32 %s1562_s11, %s1557_s6 }
  0x99   : > { %477 = vrot.lane.b32.xlu0 %v392_v46, %s2013_s29  ;;  %v435_v59 = vor.u32 %v434_v50, %v430_v40  ;;  %v619_v3 = vrot.slane %v617_v56, 1  ;;  %v624_v7 = vrot.slane %v622_v57, 1  ;;  %v629_v10 = vshll.u32 %v2334_v52, 16  ;;  %v2384_v40 = vld [vmem:[%s2275_s30 + $0x24] sm:$0xff]   ;;  %s1558_s4 = sshll.u32 %s1309_s23, 7  ;;  %s1312_s20 = sshll.u32 %s2660_s1, 4  ;;  %s2683_s20 = int_to_ptr.vmem [resolvable:$true] %s1312_s20 }
  0x9a   : > { %v668_v12 = vor.u32 %v667_v55, %v663_v5  ;;  %v679_v13 = vrot.slane %v677_v61, 1  ;;  %v682_v14 = vshll.u32 %v1755_v58, 16  ;;  %v627_v16 = vshrl.u32 %v2334_v52, 16  ;;  %v2398_v48 = vld [vmem:[%s2275_s30 + $0x5c] ss:$0 sps:$4 sm:$0x11]  }
  0x9b   : > { %v440_v6 = vsel %vm380_vm1, %v435_v59, %v439_v51  ;;  %v620_v15 = vor.u32 %v619_v3, %v615_v60  ;;  %v631_v17 = vrot.slane %v629_v10, 1  ;;  %v634_v18 = vshll.u32 %v1756_v62, 16  ;;  %v2405_v53 = vld [vmem:[%s2275_s30 + $0x2c] ss:$0 sps:$4 sm:$0x11]   ;;  %v2415_v59 = vld [vmem:[%s2275_s30 + $0x18] sm:$0xff]  }
  0x9c   : > { %487 = vrot.lane.b32.xlu1 %v452_v54, %s2013_s29  ;;  %v673_v19 = vsel %vm380_vm1, %v668_v12, %v672_v63  ;;  %v680_v20 = vor.u32 %v679_v13, %v675_v8  ;;  %v684_v21 = vrot.slane %v682_v14, 1  ;;  %v738_v25 = vrot.slane %v2278_v0, 1  ;;  %v2408_v54 = vld [vmem:[%s2275_s30 + $0x48] sm:$0xff]   ;;  %p2789_p3 = scmp.ne.s32.totalorder %s2773_s28, 0 }
  0x9d   : > { %485 = vrot.lane.b32.xlu0 %v440_v6, %s2013_s29  ;;  %v625_v5 = vsel %vm380_vm1, %v620_v15, %v624_v7  ;;  %v632_v22 = vor.u32 %v631_v17, %v627_v16  ;;  %v636_v23 = vrot.slane %v634_v18, 1  ;;  %v739_v26 = vrot.slane %v1753_v44, 1  ;;  %v2422_v7 = vld [vmem:[%s2275_s30 + $0x50] ss:$0 sps:$4 sm:$0x11]  }
  0x9e   : > { %v685_v24 = vsel %vm380_vm1, %v680_v20, %v684_v21  ;;  %v726_v28 = vrot.slane %v2281_v1, 1  ;;  %v727_v29 = vrot.slane %v1754_v49, 1  ;;  %v741_v32 = vrot.slane %v2322_v36, 1  ;;  %v2373_v1 = vld [vmem:[%s2275_s30 + $0x18] sm:$0xff]  }
  0x9f   : > { %v637_v27 = vsel %vm380_vm1, %v632_v22, %v636_v23  ;;  %v740_v31 = vsel %vm493_vm0, %v738_v25, %v739_v26  ;;  %v742_v0 = vrot.slane %v1755_v58, 1  ;;  %v729_v34 = vrot.slane %v2334_v52, 1  ;;  %v2432_v17 = vld [vmem:[%s2275_s30 + $0x20] ss:$0 sps:$4 sm:$0x11]   ;;  %v2441_v22 = vld [vmem:[%s2275_s30 + $0x54] sm:$0xff]  }
  0xa0   : > { %584 = vrot.lane.b32.xlu1 %v2322_v36, %s2011_s27  ;;  %v728_v33 = vsel %vm493_vm0, %v726_v28, %v727_v29  ;;  %v730_v35 = vrot.slane %v1756_v62, 1  ;;  %v897_v39 = vshll.u32 %v2364_v30, 16  ;;  %v2387_v36 = vld [vmem:[%s2275_s30 + $0x20] ss:$0 sps:$4 sm:$0x11]   ;;  %v849_v43 = vshll.u32 %v2373_v1, 16 }
  0xa1   : > { %576 = vrot.lane.b32.xlu0 %v2334_v52, %s2011_s27  ;;  %v743_v41 = vsel %vm493_vm0, %v741_v32, %v742_v0  ;;  %v895_v44 = vshrl.u32 %v2364_v30, 16  ;;  %v902_v46 = vshll.u32 %v2376_v37, 16  ;;  %v854_v47 = vshll.u32 %v2387_v36, 16  ;;  %v2454_v32 = vld [vmem:[%s2275_s30 + $0x5c] ss:$0 sps:$4 sm:$0x11]  }
  0xa2   : > { %v731_v42 = vsel %vm493_vm0, %v729_v34, %v730_v35  ;;  %v899_v45 = vrot.slane %v897_v39, 1  ;;  %v909_v49 = vshll.u32 %v2379_v38, 16  ;;  %v861_v50 = vshll.u32 %v2384_v40, 16 }
  0xa3   : > { %v847_v51 = vshrl.u32 %v2373_v1, 16  ;;  %v851_v52 = vrot.slane %v849_v43, 1  ;;  %v904_v56 = vrot.slane %v902_v46, 1  ;;  %v907_v57 = vshrl.u32 %v2379_v38, 16  ;;  %v1790_v43 = vld [vmem:[#allocation5 + $0x8] sm:$0xff]  }
  0xa4   : > { %718 = vrot.lane.b32.xlu1 %v673_v19, %s2014_s26  ;;  %v900_v55 = vor.u32 %v899_v45, %v895_v44  ;;  %v859_v58 = vshrl.u32 %v2384_v40, 16  ;;  %v856_v60 = vrot.slane %v854_v47, 1  ;;  %v911_v61 = vrot.slane %v909_v49, 1 }
  0xa5   : > { %710 = vrot.lane.b32.xlu0 %v625_v5, %s2014_s26  ;;  %v914_v62 = vshll.u32 %v2398_v48, 16  ;;  %v863_v63 = vrot.slane %v861_v50, 1  ;;  %v852_v3 = vor.u32 %v851_v52, %v847_v51  ;;  %v866_v6 = vshll.u32 %v2405_v53, 16 }
  0xa6   : > { %v905_v8 = vsel %vm380_vm1, %v900_v55, %v904_v56  ;;  %v912_v10 = vor.u32 %v911_v61, %v907_v57  ;;  %v456_v13 = vshll.u32 %v2408_v54, 16  ;;  %v408_v18 = vshll.u32 %v2415_v59, 16 }
  0xa7   : > { %v916_v12 = vrot.slane %v914_v62, 1  ;;  %v857_v14 = vsel %vm380_vm1, %v852_v3, %v856_v60  ;;  %v864_v15 = vor.u32 %v863_v63, %v859_v58  ;;  %v868_v16 = vrot.slane %v866_v6, 1 }
  0xa8   : > { %720 = vrot.lane.b32.xlu1 %v685_v24, %s2014_s26  ;;  %v970_v19 = vrot.slane %v2364_v30, 1  ;;  %v971_v20 = vrot.slane %v2376_v37, 1  ;;  %v958_v21 = vrot.slane %v2373_v1, 1  ;;  %v461_v5 = vshll.u32 %v2422_v7, 16  ;;  %v1789_v37 = vld [vmem:[#allocation5] sm:$0xff]  }
  0xa9   : > { %712 = vrot.lane.b32.xlu0 %v637_v27, %s2014_s26  ;;  %v917_v23 = vsel %vm380_vm1, %v912_v10, %v916_v12  ;;  %v959_v24 = vrot.slane %v2387_v36, 1  ;;  %v454_v25 = vshrl.u32 %v2408_v54, 16  ;;  %v458_v26 = vrot.slane %v456_v13, 1  ;;  %1574 = vmatprep.subr.bf16.mxu0 %v1789_v37  ;;  %v1791_v12 = vld [vmem:[#allocation5 + $0x10] ss:$0 sps:$4 sm:$0x33]  }
  0xaa   : > { %v869_v27 = vsel %vm380_vm1, %v864_v15, %v868_v16  ;;  %v406_v28 = vshrl.u32 %v2415_v59, 16  ;;  %v410_v29 = vrot.slane %v408_v18, 1  ;;  %v463_v0 = vrot.slane %v461_v5, 1  ;;  %1596 = vmatprep.subr.bf16.mxu1 %v1789_v37  ;;  %1575 = vmatpush3.bf16.msra.mxu0 %v1789_v37  ;;  %v1775_v5 = vld [vmem:[%s2275_s30 + $0x60] sm:$0xff]  }
  0xab   : > { %v972_v34 = vsel %vm493_vm0, %v970_v19, %v971_v20  ;;  %v459_v35 = vor.u32 %v458_v26, %v454_v25  ;;  %v960_v39 = vsel %vm493_vm0, %v958_v21, %v959_v24  ;;  %v973_v44 = vrot.slane %v2379_v38, 1  ;;  %1599 = vmatpush3.bf16.msra.mxu1 %v1789_v37  ;;  %1576 = vmatprep.subr.bf16.mxu0 %v1790_v43  ;;  %v2501_v19 = vld [vmem:[%s2275_s30 + $0x24] sm:$0xff]   ;;  %v1776_v26 = vld [vmem:[%s2275_s30 + $0x30] sm:$0xff]   ;;  %v1780_v37 = vld [vmem:[%s2275_s30 + $0x38] ss:$0 sps:$4 sm:$0x11]  }
  0xac   : > { %758 = vrot.lane.b32.xlu1 %v740_v31, %s2015_s24  ;;  %v2451_v31 = vld [vmem:[%s2275_s30 + $0x24] sm:$0xff]   ;;  %v411_v36 = vor.u32 %v410_v29, %v406_v28  ;;  %v974_v45 = vrot.slane %v2398_v48, 1  ;;  %v961_v46 = vrot.slane %v2384_v40, 1  ;;  %v962_v47 = vrot.slane %v2405_v53, 1  ;;  %1597 = vmatprep.subr.bf16.mxu1 %v1790_v43 }
  0xad   : > { %750 = vrot.lane.b32.xlu0 %v728_v33, %s2015_s24  ;;  %v468_v33 = vshll.u32 %v2441_v22, 16  ;;  %v464_v49 = vsel %vm380_vm1, %v459_v35, %v463_v0  ;;  %v466_v50 = vshrl.u32 %v2441_v22, 16  ;;  %v473_v52 = vshll.u32 %v2454_v32, 16 }
  0xae   : > { %1577 = vmatpush3.bf16.msra.mxu0 %v1790_v43  ;;  %v975_v53 = vsel %vm493_vm0, %v973_v44, %v974_v45  ;;  %v963_v58 = vsel %vm493_vm0, %v961_v46, %v962_v47  ;;  %v512_v63 = vrot.slane %v2408_v54, 1  ;;  %v513_v3 = vrot.slane %v2422_v7, 1  ;;  %v2495_v7 = vld [vmem:[%s2275_s30 + $0x54] sm:$0xff]  }
  0xaf   : > { %v470_v51 = vrot.slane %v468_v33, 1  ;;  %v475_v57 = vrot.slane %v473_v52, 1  ;;  %1600 = vmatpush3.bf16.msra.mxu1 %v1790_v43  ;;  %v501_v10 = vrot.slane %v2432_v17, 1  ;;  %v516_v15 = vrot.slane %v2454_v32, 1  ;;  %1602 = vmatprep.subr.msk.bf16.mxu0 %vm1178_vm2, %v1791_v12 }
  0xb0   : > { %760 = vrot.lane.b32.xlu1 %v743_v41, %s2015_s24  ;;  %v514_v13 = vsel %vm493_vm0, %v512_v63, %v513_v3  ;;  %v503_v18 = vrot.slane %v2451_v31, 1  ;;  %1603 = vmatprep.subr.msk.bf16.mxu1 %vm1178_vm2, %v1791_v12  ;;  %v1180_v20 = vsel %vm1178_vm2, %v1791_v12, 0  ;;  %v689_v24 = vshll.u32 %v2495_v7, 16  ;;  %v1779_v33 = vld [vmem:[%s2275_s30 + $0x68] ss:$0 sps:$4 sm:$0x11]  }
  0xb1   : > { %752 = vrot.lane.b32.xlu0 %v731_v42, %s2015_s24  ;;  %v420_v42 = vshll.u32 %v2451_v31, 16  ;;  %v471_v56 = vor.u32 %v470_v51, %v466_v50  ;;  %v641_v28 = vshll.u32 %v2501_v19, 16  ;;  %v687_v29 = vshrl.u32 %v2495_v7, 16 }
  0xb2   : > { %1579 = vmatpush3.bf16.msra.mxu0 %v1180_v20  ;;  %v691_v32 = vrot.slane %v689_v24, 1  ;;  %v706_v45 = vshll.u32 %v1779_v33, 16  ;;  %v658_v50 = vshll.u32 %v1780_v37, 16  ;;  %v747_v63 = vrot.slane %v1775_v5, 1 }
  0xb3   : > { %v422_v48 = vrot.slane %v420_v42, 1  ;;  %v476_v62 = vsel %vm380_vm1, %v471_v56, %v475_v57  ;;  %1601 = vmatpush3.bf16.msra.mxu1 %v1180_v20  ;;  %v643_v35 = vrot.slane %v641_v28, 1  ;;  %v744_v56 = vrot.slane %v2495_v7, 1 }
  0xb4   : > { %814 = vrot.lane.b32.xlu1 %v2364_v30, %s2016_s8  ;;  %v413_v30 = vshll.u32 %v2432_v17, 16  ;;  %v692_v42 = vor.u32 %v691_v32, %v687_v29  ;;  %v748_v3 = vrot.slane %v1779_v33, 1  ;;  %v736_v12 = vrot.slane %v1780_v37, 1  ;;  %v1788_v29 = vld [vmem:[%s2275_s30 + $0x44] ss:$0 sps:$4 sm:$0x11]  }
  0xb5   : > { %806 = vrot.lane.b32.xlu0 %v2373_v1, %s2016_s8  ;;  %v2461_v1 = vld [vmem:[%s2275_s30 + $0x2c] ss:$0 sps:$4 sm:$0x11]   ;;  %vm1100_vm9 = vcmask 228352   ;;  %vm1117_vm10 = vcmask 261120   ;;  %vm1161_vm11 = vcmask 293888  }
  0xb6   : > { %v415_v41 = vrot.slane %v413_v30, 1  ;;  %v504_v17 = vrot.slane %v2461_v1, 1  ;;  %v639_v30 = vshrl.u32 %v2501_v19, 16 }
  0xb8   : > { %816 = vrot.lane.b32.xlu1 %v2379_v38, %s2016_s8  ;;  %v416_v55 = vsel %vm380_vm1, %v411_v36, %v415_v41  ;;  %v418_v38 = vshrl.u32 %v2451_v31, 16  ;;  %v505_v25 = vsel %vm493_vm0, %v503_v18, %v504_v17  ;;  %v699_v36 = vshrl.u32 %v1775_v5, 16  ;;  %v1784_v17 = vld [vmem:[%s2275_s30 + $0x3c] sm:$0xff]  }
  0xb9   : > { %808 = vrot.lane.b32.xlu0 %v2384_v40, %s2016_s8  ;;  %v425_v40 = vshll.u32 %v2461_v1, 16  ;;  %v651_v41 = vshrl.u32 %v1776_v26, 16  ;;  %v644_v46 = vor.u32 %v643_v35, %v639_v30  ;;  %v885_v30 = vshll.u32 %v1784_v17, 16 }
  0xba   : > { %v423_v60 = vor.u32 %v422_v48, %v418_v38 }
  0xbb   : > { %v427_v61 = vrot.slane %v425_v40, 1  ;;  %v660_v40 = vrot.slane %v658_v50, 1 }
  0xbc   : > { %950 = vrot.lane.b32.xlu1 %v905_v8, %s2017_s7  ;;  %v500_v8 = vrot.slane %v2415_v59, 1 }
  0xbd   : > { %942 = vrot.lane.b32.xlu0 %v857_v14, %s2017_s7  ;;  %v428_v6 = vsel %vm380_vm1, %v423_v60, %v427_v61  ;;  %v515_v14 = vrot.slane %v2441_v22, 1  ;;  %v732_v60 = vrot.slane %v2501_v19, 1 }
  0xbe   : > { %v502_v16 = vsel %vm493_vm0, %v500_v8, %v501_v10  ;;  %v735_v10 = vrot.slane %v1776_v26, 1 }
  0xbf   : > { %v517_v21 = vsel %vm493_vm0, %v515_v14, %v516_v15  ;;  %v749_v14 = vsel %vm493_vm0, %v747_v63, %v748_v3  ;;  %v2543_v15 = vld [vmem:[%s2275_s30 + $0x6c] sm:$0xff]  }
  0xc0   : > { %952 = vrot.lane.b32.xlu1 %v917_v23, %s2017_s7  ;;  %v1777_v23 = vld [vmem:[%s2275_s30 + $0x5c] ss:$0 sps:$4 sm:$0x11]   ;;  %v737_v18 = vsel %vm493_vm0, %v735_v10, %v736_v12  ;;  %v931_v32 = vshrl.u32 %v2543_v15, 16 }
  0xc1   : > { %944 = vrot.lane.b32.xlu0 %v869_v27, %s2017_s7  ;;  %v1778_v27 = vld [vmem:[%s2275_s30 + $0x2c] ss:$0 sps:$4 sm:$0x11]   ;;  %v694_v0 = vshll.u32 %v1777_v23, 16  ;;  %v745_v57 = vrot.slane %v1777_v23, 1 }
  0xc2   : > { %v646_v1 = vshll.u32 %v1778_v27, 16  ;;  %v733_v61 = vrot.slane %v1778_v27, 1 }
  0xc3   : > { %v696_v43 = vrot.slane %v694_v0, 1  ;;  %v883_v0 = vshrl.u32 %v1784_v17, 16 }
  0xc4   : > { %990 = vrot.lane.b32.xlu1 %v972_v34, %s2018_s5  ;;  %v701_v34 = vshll.u32 %v1775_v5, 16  ;;  %v648_v47 = vrot.slane %v646_v1, 1  ;;  %v734_v8 = vsel %vm493_vm0, %v732_v60, %v733_v61  ;;  %v967_v61 = vrot.slane %v1784_v17, 1 }
  0xc5   : > { %982 = vrot.lane.b32.xlu0 %v960_v39, %s2018_s5  ;;  %v653_v39 = vshll.u32 %v1776_v26, 16  ;;  %v697_v51 = vsel %vm380_vm1, %v692_v42, %v696_v43 }
  0xc6   : > { %v703_v44 = vrot.slane %v701_v34, 1  ;;  %v649_v38 = vsel %vm380_vm1, %v644_v46, %v648_v47 }
  0xc8   : > { %489 = vrot.lane.b32.xlu1 %v464_v49, %s2013_s29  ;;  %v655_v49 = vrot.slane %v653_v39, 1  ;;  %v704_v52 = vor.u32 %v703_v44, %v699_v36  ;;  %v887_v36 = vrot.slane %v885_v30, 1 }
  0xc9   : > { %481 = vrot.lane.b32.xlu0 %v416_v55, %s2013_s29  ;;  %v708_v55 = vrot.slane %v706_v45, 1 }
  0xca   : > { %v656_v48 = vor.u32 %v655_v49, %v651_v41  ;;  %v890_v41 = vshll.u32 %v1788_v29, 16  ;;  %v888_v46 = vor.u32 %v887_v36, %v883_v0 }
  0xcc   : > { %992 = vrot.lane.b32.xlu1 %v975_v53, %s2018_s5  ;;  %v709_v53 = vsel %vm380_vm1, %v704_v52, %v708_v55  ;;  %v892_v47 = vrot.slane %v890_v41, 1 }
  0xcd   : > { %984 = vrot.lane.b32.xlu0 %v963_v58, %s2018_s5  ;;  %v661_v58 = vsel %vm380_vm1, %v656_v48, %v660_v40 }
  0xd0   : > { %491 = vrot.lane.b32.xlu1 %v476_v62, %s2013_s29  ;;  %v746_v62 = vsel %vm493_vm0, %v744_v56, %v745_v57  ;;  %v979_v57 = vrot.slane %v2543_v15, 1 }
  0xd1   : > { %483 = vrot.lane.b32.xlu0 %v428_v6, %s2013_s29  ;;  %v1781_v6 = vld [vmem:[%s2275_s30 + $0x60] sm:$0xff]   ;;  %s1878_s29 = scalar_lea.vmem %s2683_s20, 2048 }
  0xd2   : > { %v976_v52 = vrot.slane %v1781_v6, 1  ;;  %p1879_p4 = scmp.ne.s32.totalorder %s2683_s20, %s1878_s29 }
  0xd4   : > { %530 = vrot.lane.b32.xlu1 %v514_v13, %s2012_s25  ;;  %v1782_v13 = vld [vmem:[%s2275_s30 + $0x30] sm:$0xff]   ;;  %p1880_p7 = pnand %p1879_p4, %p2789_p3 }
  0xd5   : > { %522 = vrot.lane.b32.xlu0 %v502_v16, %s2012_s25  ;;  %v921_v16 = vshll.u32 %v1781_v6, 16  ;;  %v873_v20 = vshll.u32 %v1782_v13, 16  ;;  %v964_v48 = vrot.slane %v1782_v13, 1 }
  0xd6   : > { %p1881_p13 = pneg %p1880_p7 }
  0xd7   : > { %v923_v23 = vrot.slane %v921_v16, 1  ;;  %v875_v27 = vrot.slane %v873_v20, 1 }
  0xd8   : > { %532 = vrot.lane.b32.xlu1 %v517_v21, %s2012_s25  ;;  %v919_v21 = vshrl.u32 %v1781_v6, 16 }
  0xd9   : > { %524 = vrot.lane.b32.xlu0 %v505_v25, %s2012_s25  ;;  %v1787_v25 = vld [vmem:[%s2275_s30 + $0x74] ss:$0 sps:$4 sm:$0x11]  }
  0xda   : > { %v924_v33 = vor.u32 %v923_v23, %v919_v21  ;;  %v938_v1 = vshll.u32 %v1787_v25, 16 }
  0xdc   : > { %586 = vrot.lane.b32.xlu1 %v2495_v7, %s2011_s27  ;;  %v1785_v7 = vld [vmem:[%s2275_s30 + $0x68] ss:$0 sps:$4 sm:$0x11]   ;;  %v940_v44 = vrot.slane %v938_v1, 1 }
  0xdd   : > { %578 = vrot.lane.b32.xlu0 %v2501_v19, %s2011_s27  ;;  %v1786_v19 = vld [vmem:[%s2275_s30 + $0x38] ss:$0 sps:$4 sm:$0x11]   ;;  %v926_v24 = vshll.u32 %v1785_v7, 16  ;;  %v977_v55 = vrot.slane %v1785_v7, 1  ;;  %s2679_s30 = scalar_lea.hbm %s2755_s3, %s1558_s4 }
  0xde   : > { %v878_v28 = vshll.u32 %v1786_v19, 16  ;;  %v965_v40 = vrot.slane %v1786_v19, 1 }
  0xdf   : > { %v928_v34 = vrot.slane %v926_v24, 1  ;;  %v978_v56 = vsel %vm493_vm0, %v976_v52, %v977_v55 }
  0xe0   : > { %588 = vrot.lane.b32.xlu1 %v1775_v5, %s2011_s27  ;;  %v871_v5 = vshrl.u32 %v1782_v13, 16  ;;  %v880_v39 = vrot.slane %v878_v28, 1  ;;  %v966_v60 = vsel %vm493_vm0, %v964_v48, %v965_v40 }
  0xe1   : > { %580 = vrot.lane.b32.xlu0 %v1776_v26, %s2011_s27  ;;  %v933_v26 = vshll.u32 %v2543_v15, 16  ;;  %v929_v42 = vsel %vm380_vm1, %v924_v33, %v928_v34  ;;  %s2690_s27 = scalar_lea.sflag [#allocation4], %s227_s12 }
  0xe2   : > { %v876_v37 = vor.u32 %v875_v27, %v871_v5 }
  0xe3   : > { %v935_v35 = vrot.slane %v933_v26, 1 }
  0xe4   : > { %722 = vrot.lane.b32.xlu1 %v697_v51, %s2014_s26  ;;  %v881_v45 = vsel %vm380_vm1, %v876_v37, %v880_v39 }
  0xe5   : > { %714 = vrot.lane.b32.xlu0 %v649_v38, %s2014_s26  ;;  %v936_v43 = vor.u32 %v935_v35, %v931_v32  ;;  %v893_v38 = vsel %vm380_vm1, %v888_v46, %v892_v47 }
  0xe7   : > { %v941_v51 = vsel %vm380_vm1, %v936_v43, %v940_v44 }
  0xe8   : > { %724 = vrot.lane.b32.xlu1 %v709_v53, %s2014_s26 }
  0xe9   : > { %716 = vrot.lane.b32.xlu0 %v661_v58, %s2014_s26  ;;  %v980_v58 = vrot.slane %v1787_v25, 1  ;;  %s2019_s26 = smov [#allocation8]  }
  0xec   : > { %762 = vrot.lane.b32.xlu1 %v746_v62, %s2015_s24  ;;  %v968_v62 = vrot.slane %v1788_v29, 1 }
  0xed   : > { %754 = vrot.lane.b32.xlu0 %v734_v8, %s2015_s24 }
  0xee   : > { %v969_v8 = vsel %vm493_vm0, %v967_v61, %v968_v62 }
  0xf0   : > { %764 = vrot.lane.b32.xlu1 %v749_v14, %s2015_s24 }
  0xf1   : > { %756 = vrot.lane.b32.xlu0 %v737_v18, %s2015_s24  ;;  %s1882_s24 = sshll.u32 %s2019_s26, 4  ;;  %s1883_s24 = int_to_ptr.vmem [resolvable:$false] %s1882_s24 }
  0xf2   : > { %p1885_p9 = scmp.lt.s32.totalorder %s2683_s20, %s1883_s24 }
  0xf4   : > { %818 = vrot.lane.b32.xlu1 %v1781_v6, %s2016_s8  ;;  %v981_v6 = vsel %vm493_vm0, %v979_v57, %v980_v58 }
  0xf5   : > { %810 = vrot.lane.b32.xlu0 %v1782_v13, %s2016_s8 }
  0xf8   : > { %820 = vrot.lane.b32.xlu1 %v2543_v15, %s2016_s8 }
  0xf9   : > { %812 = vrot.lane.b32.xlu0 %v1784_v17, %s2016_s8  ;;  %s1884_s8 = scalar_lea.vmem %s1883_s24, 4096 }
  0xfa   : > { %p1886_p11 = scmp.lt.s32.totalorder %s1884_s8, %s1878_s29 }
  0xfc   : > { %954 = vrot.lane.b32.xlu1 %v929_v42, %s2017_s7  ;;  %p1887_p0 = por %p1886_p11, %p1885_p9 }
  0xfd   : > { %946 = vrot.lane.b32.xlu0 %v881_v45, %s2017_s7 }
  0xfe   : > { %v583_v49 = vpop.permute.xlu1 %582  ;;  %v575_v50 = vpop.permute.xlu0 %574  ;;  %p1888_p5 = pnand %p1887_p0, %p1881_p13 }
 0x100   : > { %956 = vrot.lane.b32.xlu1 %v941_v51, %s2017_s7 }
 0x101   : > { %948 = vrot.lane.b32.xlu0 %v893_v38, %s2017_s7 }
 0x102   : > { %v527_v53 = vpop.permute.xlu1 %526 }
 0x103   : > { %v519_v63 = vpop.permute.xlu0 %518 }
 0x104   : > { %994 = vrot.lane.b32.xlu1 %v978_v56, %s2018_s5 }
 0x105   : > { %986 = vrot.lane.b32.xlu0 %v966_v60, %s2018_s5 }
 0x106   : > { %v529_v3 = vpop.permute.xlu1 %528 }
 0x107   : > { %v521_v10 = vpop.permute.xlu0 %520 }
 0x108   : > { %996 = vrot.lane.b32.xlu1 %v981_v6, %s2018_s5 }
 0x109   : > { %988 = vrot.lane.b32.xlu0 %v969_v8, %s2018_s5 }
 0x10a   : > { %v480_v12 = vpop.permute.xlu1 %479 }
 0x10b   : > { %v478_v13 = vpop.permute.xlu0 %477  ;;  %v1002_v47 = vsel %vm998_vm3, %v2302_v11, %v480_v12 }
 0x10c   : > { %v1000_v30 = vsel %vm998_vm3, %v2292_v4, %v478_v13  ;;  %v1019_v38 = vsel %vm1015_vm4, %v1002_v47, %v521_v10 }
 0x10d   : > { %v1017_v34 = vsel %vm1015_vm4, %v1000_v30, %v519_v63 }
 0x10e   : > { %v488_v14 = vpop.permute.xlu1 %487 }
 0x10f   : > { %v486_v15 = vpop.permute.xlu0 %485  ;;  %v1010_v43 = vsel %vm998_vm3, %v2298_v9, %v488_v14 }
 0x110   : > { %v1008_v29 = vsel %vm998_vm3, %v2288_v2, %v486_v15  ;;  %v1034_v2 = vsel %vm1032_vm5, %v1017_v34, %v575_v50  ;;  %v1027_v55 = vsel %vm1015_vm4, %v1010_v43, %v529_v3 }
 0x111   : > { %v1025_v0 = vsel %vm1015_vm4, %v1008_v29, %v527_v53 }
 0x112   : > { %v585_v7 = vpop.permute.xlu1 %584  ;;  %v1042_v35 = vsel %vm1032_vm5, %v1025_v0, %v583_v49 }
 0x113   : > { %v577_v16 = vpop.permute.xlu0 %576  ;;  %v1044_v9 = vsel %vm1032_vm5, %v1027_v55, %v585_v7 }
 0x114   : > { %v1036_v11 = vsel %vm1032_vm5, %v1019_v38, %v577_v16 }
 0x116   : > { %v719_v18 = vpop.permute.xlu1 %718 }
 0x117   : > { %v711_v17 = vpop.permute.xlu0 %710  ;;  %v1059_v37 = vsel %vm1049_vm6, %v1042_v35, %v719_v18 }
 0x118   : > { %v1051_v4 = vsel %vm1049_vm6, %v1034_v2, %v711_v17 }
 0x11a   : > { %v721_v19 = vpop.permute.xlu1 %720 }
 0x11b   : > { %v713_v20 = vpop.permute.xlu0 %712  ;;  %v1061_v40 = vsel %vm1049_vm6, %v1044_v9, %v721_v19 }
 0x11c   : > { %v1053_v56 = vsel %vm1049_vm6, %v1036_v11, %v713_v20 }
 0x11e   : > { %v759_v21 = vpop.permute.xlu1 %758 }
 0x11f   : > { %v751_v5 = vpop.permute.xlu0 %750  ;;  %v1076_v36 = vsel %vm1066_vm7, %v1059_v37, %v759_v21 }
 0x120   : > { %v1068_v41 = vsel %vm1066_vm7, %v1051_v4, %v751_v5 }
 0x122   : > { %v761_v23 = vpop.permute.xlu1 %760 }
 0x123   : > { %v753_v24 = vpop.permute.xlu0 %752  ;;  %v1078_v57 = vsel %vm1066_vm7, %v1061_v40, %v761_v23 }
 0x124   : > { %v1070_v58 = vsel %vm1066_vm7, %v1053_v56, %v753_v24 }
 0x126   : > { %v815_v25 = vpop.permute.xlu1 %814 }
 0x127   : > { %v807_v26 = vpop.permute.xlu0 %806  ;;  %v1093_v42 = vsel %vm1083_vm8, %v1076_v36, %v815_v25 }
 0x128   : > { %v1085_v44 = vsel %vm1083_vm8, %v1068_v41, %v807_v26 }
 0x12a   : > { %v817_v27 = vpop.permute.xlu1 %816 }
 0x12b   : > { %v809_v28 = vpop.permute.xlu0 %808  ;;  %v1095_v60 = vsel %vm1083_vm8, %v1078_v57, %v817_v27 }
 0x12c   : > { %v1087_v61 = vsel %vm1083_vm8, %v1070_v58, %v809_v28 }
 0x12e   : > { %v951_v32 = vpop.permute.xlu1 %950 }
 0x12f   : > { %v943_v33 = vpop.permute.xlu0 %942  ;;  %v1110_v45 = vsel %vm1100_vm9, %v1093_v42, %v951_v32 }
 0x130   : > { %v1102_v49 = vsel %vm1100_vm9, %v1085_v44, %v943_v33 }
 0x132   : > { %v953_v1 = vpop.permute.xlu1 %952 }
 0x133   : > { %v945_v39 = vpop.permute.xlu0 %944  ;;  %v1112_v62 = vsel %vm1100_vm9, %v1095_v60, %v953_v1 }
 0x134   : > { %v1104_v3 = vsel %vm1100_vm9, %v1087_v61, %v945_v39 }
 0x136   : > { %v991_v46 = vpop.permute.xlu1 %990 }
 0x137   : > { %v983_v50 = vpop.permute.xlu0 %982  ;;  %v1127_v51 = vsel %vm1117_vm10, %v1110_v45, %v991_v46 }
 0x138   : > { %v1119_v52 = vsel %vm1117_vm10, %v1102_v49, %v983_v50  ;;  %1588 = vmatprep.mubr.msk.bf16.mxu1 %vm1161_vm11, %v1127_v51 }
 0x139   : > { %1580 = vmatprep.mubr.msk.bf16.mxu0 %vm1161_vm11, %v1119_v52 }
 0x13a   : > { %v490_v48 = vpop.permute.xlu1 %489 }
 0x13b   : > { %v482_v53 = vpop.permute.xlu0 %481  ;;  %v1012_v14 = vsel %vm998_vm3, %v2408_v54, %v490_v48 }
 0x13c   : > { %v1004_v7 = vsel %vm998_vm3, %v2415_v59, %v482_v53 }
 0x13e   : > { %v993_v63 = vpop.permute.xlu1 %992 }
 0x13f   : > { %v1129_v6 = vsel %vm1117_vm10, %v1112_v62, %v993_v63  ;;  %v985_v8 = vpop.permute.xlu0 %984 }
 0x140   : > { %v1121_v10 = vsel %vm1117_vm10, %v1104_v3, %v985_v8  ;;  %1589 = vmatmul.mubr.msk.bf16.vlgmr.msra.gmra.mrb[0].mxu1 %vm1161_vm11, %v1129_v6  ;;  %v1542_v8 = vld [vmem:[#allocation7] ss:$0 sm:$0xff] }
 0x141   : > { %1581 = vmatmul.mubr.msk.bf16.vlgmr.msra.gmra.mrb[0].mxu0 %vm1161_vm11, %v1121_v10 }
 0x142   : > { %v492_v12 = vpop.permute.xlu1 %491 }
 0x143   : > { %v484_v13 = vpop.permute.xlu0 %483  ;;  %v1014_v19 = vsel %vm998_vm3, %v2441_v22, %v492_v12 }
 0x144   : > { %v1006_v21 = vsel %vm998_vm3, %v2451_v31, %v484_v13 }
 0x146   : > { %v531_v15 = vpop.permute.xlu1 %530 }
 0x147   : > { %v1029_v16 = vsel %vm1015_vm4, %v1012_v14, %v531_v15  ;;  %v523_v18 = vpop.permute.xlu0 %522 }
 0x148   : > { %v1021_v17 = vsel %vm1015_vm4, %v1004_v7, %v523_v18 }
 0x14a   : > { %v533_v20 = vpop.permute.xlu1 %532 }
 0x14b   : > { %v1031_v5 = vsel %vm1015_vm4, %v1014_v19, %v533_v20  ;;  %v525_v23 = vpop.permute.xlu0 %524 }
 0x14c   : > { %v1023_v54 = vsel %vm1015_vm4, %v1006_v21, %v525_v23 }
 0x14e   : > { %v587_v24 = vpop.permute.xlu1 %586 }
 0x14f   : > { %v579_v25 = vpop.permute.xlu0 %578  ;;  %v1046_v39 = vsel %vm1032_vm5, %v1029_v16, %v587_v24 }
 0x150   : > { %v1038_v36 = vsel %vm1032_vm5, %v1021_v17, %v579_v25 }
 0x152   : > { %v589_v59 = vpop.permute.xlu1 %588 }
 0x153   : > { %v581_v26 = vpop.permute.xlu0 %580  ;;  %v1048_v47 = vsel %vm1032_vm5, %v1031_v5, %v589_v59 }
 0x154   : > { %v1040_v52 = vsel %vm1032_vm5, %v1023_v54, %v581_v26 }
 0x156   : > { %v723_v27 = vpop.permute.xlu1 %722 }
 0x157   : > { %v715_v28 = vpop.permute.xlu0 %714  ;;  %v1063_v41 = vsel %vm1049_vm6, %v1046_v39, %v723_v27 }
 0x158   : > { %v1055_v43 = vsel %vm1049_vm6, %v1038_v36, %v715_v28 }
 0x15a   : > { %v725_v29 = vpop.permute.xlu1 %724 }
 0x15b   : > { %v717_v30 = vpop.permute.xlu0 %716  ;;  %v1065_v55 = vsel %vm1049_vm6, %v1048_v47, %v725_v29 }
 0x15c   : > { %v1057_v11 = vsel %vm1049_vm6, %v1040_v52, %v717_v30 }
 0x15e   : > { %v763_v32 = vpop.permute.xlu1 %762 }
 0x15f   : > { %v755_v0 = vpop.permute.xlu0 %754  ;;  %v1080_v44 = vsel %vm1066_vm7, %v1063_v41, %v763_v32 }
 0x160   : > { %v1072_v45 = vsel %vm1066_vm7, %v1055_v43, %v755_v0 }
 0x162   : > { %v765_v22 = vpop.permute.xlu1 %764 }
 0x163   : > { %v757_v33 = vpop.permute.xlu0 %756  ;;  %v1082_v40 = vsel %vm1066_vm7, %v1065_v55, %v765_v22 }
 0x164   : > { %v1074_v56 = vsel %vm1066_vm7, %v1057_v11, %v757_v33 }
 0x166   : > { %v819_v34 = vpop.permute.xlu1 %818 }
 0x167   : > { %v811_v35 = vpop.permute.xlu0 %810  ;;  %v1097_v46 = vsel %vm1083_vm8, %v1080_v44, %v819_v34 }
 0x168   : > { %v1089_v49 = vsel %vm1083_vm8, %v1072_v45, %v811_v35 }
 0x16a   : > { %v821_v31 = vpop.permute.xlu1 %820 }
 0x16b   : > { %v813_v1 = vpop.permute.xlu0 %812  ;;  %v1099_v57 = vsel %vm1083_vm8, %v1082_v40, %v821_v31 }
 0x16c   : > { %v1091_v58 = vsel %vm1083_vm8, %v1074_v56, %v813_v1 }
 0x16e   : > { %v955_v37 = vpop.permute.xlu1 %954 }
 0x16f   : > { %v947_v2 = vpop.permute.xlu0 %946  ;;  %v1114_v50 = vsel %vm1100_vm9, %v1097_v46, %v955_v37 }
 0x170   : > { %v1106_v9 = vsel %vm1100_vm9, %v1089_v49, %v947_v2 }
 0x172   : > { %v957_v4 = vpop.permute.xlu1 %956 }
 0x173   : > { %v949_v42 = vpop.permute.xlu0 %948  ;;  %v1116_v60 = vsel %vm1100_vm9, %v1099_v57, %v957_v4 }
 0x174   : > { %v1108_v62 = vsel %vm1100_vm9, %v1091_v58, %v949_v42 }
 0x176   : > { %v995_v51 = vpop.permute.xlu1 %994 }
 0x177   : > { %v1131_v38 = vsel %vm1117_vm10, %v1114_v50, %v995_v51  ;;  %v987_v48 = vpop.permute.xlu0 %986 }
 0x178   : > { %v1123_v53 = vsel %vm1117_vm10, %v1106_v9, %v987_v48  ;;  %1592 = vmatprep.mubr.msk.bf16.mxu1 %vm1161_vm11, %v1131_v38 }
 0x179   : > { %1584 = vmatprep.mubr.msk.bf16.mxu0 %vm1161_vm11, %v1123_v53 }
 0x17a   : > { %v997_v61 = vpop.permute.xlu1 %996 }
 0x17b   : > { %v1133_v63 = vsel %vm1117_vm10, %v1116_v60, %v997_v61  ;;  %v989_v3 = vpop.permute.xlu0 %988 }
 0x17c   : > { %v1125_v6 = vsel %vm1117_vm10, %v1108_v62, %v989_v3  ;;  %1593 = vmatmul.mubr.msk.bf16.gmra.mrb[4].mxu1 %vm1161_vm11, %v1133_v63 }
 0x17d   : > { %1585 = vmatmul.mubr.msk.bf16.gmra.mrb[4].mxu0 %vm1161_vm11, %v1125_v6 }
 0x213   : > { %v1590_v10 = vpop.f32.mrb[0].mxu1 }
 0x214   : > { %v1582_v12 = vpop.f32.mrb[0].mxu0  ;;  %v1257_v13 = vadd.f32 %v1590_v10, %v1542_v8  ;;  %v1248_v14 = vpop.f32.mrb[1].mxu1 }
 0x215   : > { %v1225_v15 = vadd.f32 %v1582_v12, %v1542_v8  ;;  %v1216_v7 = vpop.f32.mrb[1].mxu0  ;;  %v1249_v16 = vadd.f32 %v1542_v8, %v1248_v14  ;;  %v1591_v18 = vpop.f32.mrb[2].mxu1 }
 0x216   : > { %1289 = vst [vmem:[%s2660_s1 + $0x50] sm:$0xff] %v1257_v13  ;;  %v1217_v17 = vadd.f32 %v1542_v8, %v1216_v7  ;;  %v1583_v19 = vpop.f32.mrb[2].mxu0  ;;  %v1260_v20 = vadd.f32 %v1591_v18, %v1542_v8  ;;  %v1251_v21 = vpop.f32.mrb[3].mxu1 }
 0x217   : > { %1281 = vst [vmem:[%s2660_s1 + $0x10] sm:$0xff] %v1225_v15  ;;  %1287 = vst [vmem:[%s2660_s1 + $0x40] sm:$0xff] %v1249_v16  ;;  %v1228_v5 = vadd.f32 %v1583_v19, %v1542_v8  ;;  %v1219_v23 = vpop.f32.mrb[3].mxu0  ;;  %v1252_v54 = vadd.f32 %v1542_v8, %v1251_v21 }
 0x218   : > { %1279 = vst [vmem:[%s2660_s1] sm:$0xff] %v1217_v17  ;;  %1290 = vst [vmem:[%s2660_s1 + $0x58] sm:$0xff] %v1260_v20  ;;  %v1220_v24 = vadd.f32 %v1542_v8, %v1219_v23 }
 0x219   : > { %1282 = vst [vmem:[%s2660_s1 + $0x18] sm:$0xff] %v1228_v5  ;;  %1288 = vst [vmem:[%s2660_s1 + $0x48] sm:$0xff] %v1252_v54 }
 0x21a   : > { %1280 = vst [vmem:[%s2660_s1 + $0x8] sm:$0xff] %v1220_v24 }
 0x24f   : > { %v1594_v25 = vpop.f32.mrb[4].mxu1 }
 0x250   : > { %v1586_v59 = vpop.f32.mrb[4].mxu0  ;;  %v1273_v26 = vadd.f32 %v1594_v25, %v1542_v8  ;;  %v1264_v27 = vpop.f32.mrb[5].mxu1 }
 0x251   : > { %v1241_v28 = vadd.f32 %v1586_v59, %v1542_v8  ;;  %v1232_v29 = vpop.f32.mrb[5].mxu0  ;;  %v1265_v30 = vadd.f32 %v1542_v8, %v1264_v27  ;;  %v1595_v32 = vpop.f32.mrb[6].mxu1 }
 0x252   : > { %1293 = vst [vmem:[%s2660_s1 + $0x70] sm:$0xff] %v1273_v26  ;;  %v1233_v0 = vadd.f32 %v1542_v8, %v1232_v29  ;;  %v1587_v22 = vpop.f32.mrb[6].mxu0  ;;  %v1276_v33 = vadd.f32 %v1595_v32, %v1542_v8  ;;  %v1267_v34 = vpop.f32.mrb[7].mxu1 }
 0x253   : > { %1285 = vst [vmem:[%s2660_s1 + $0x30] sm:$0xff] %v1241_v28  ;;  %1291 = vst [vmem:[%s2660_s1 + $0x60] sm:$0xff] %v1265_v30  ;;  %v1244_v35 = vadd.f32 %v1587_v22, %v1542_v8  ;;  %v1235_v31 = vpop.f32.mrb[7].mxu0  ;;  %v1268_v1 = vadd.f32 %v1542_v8, %v1267_v34 }
 0x254   : > { %1283 = vst [vmem:[%s2660_s1 + $0x20] sm:$0xff] %v1233_v0  ;;  %1294 = vst [vmem:[%s2660_s1 + $0x78] sm:$0xff] %v1276_v33  ;;  %v1236_v37 = vadd.f32 %v1542_v8, %v1235_v31 }
 0x255   : > { %1286 = vst [vmem:[%s2660_s1 + $0x38] sm:$0xff] %v1244_v35  ;;  %1292 = vst [vmem:[%s2660_s1 + $0x68] sm:$0xff] %v1268_v1 }
 0x256   : > { %1284 = vst [vmem:[%s2660_s1 + $0x28] sm:$0xff] %v1236_v37 }
 0x257   : > { %1891 = shalt.err (!%p1888_p5)
}
 0x258   : > { %s1892_s7 = scalar_lea.hbm %s2679_s30, 2048  ;;  %s1896_s9 = scalar_lea.hbm %s2755_s3, 8192 }
 0x259   : > { %p1893_p8 = scmp.ne.s32.totalorder %s2679_s30, %s1892_s7  ;;  %p1897_p6 = scmp.lt.u32.totalorder %s2679_s30, %s2755_s3 }
 0x25a   : > { %p1898_p10 = scmp.lt.u32.totalorder %s1896_s9, %s1892_s7  ;;  %p1900_p4 = scmp.lt.u32.totalorder %s1892_s7, %s2679_s30 }
 0x25b   : > { %p1894_p12 = pnand %p1893_p8, %p2789_p3 }
 0x25c   : > { %p1899_p1 = por %p1898_p10, %p1897_p6 }
 0x25d   : > { %p1895_p2 = pneg %p1894_p12 }
 0x25e   : > { %p1901_p7 = por %p1900_p4, %p1899_p1 }
 0x260   : > { %p1902_p13 = pnand %p1901_p7, %p1895_p2 }
 0x262   : > { %1905 = shalt.err (!%p1902_p13)
}
 0x263   : > { %s2020_s6 = smov 128  }
 0x264   : > { %1617 = dma.vmem_to_hbm [thread:$0]  (%p2789_p3), %s2683_s20, 2048, %s2679_s30, %s2690_s27, %s2020_s6, %s2020_s6, %s2012_s25  }
 0x265 PF: > { %s2790_s23 = sld [smem:[#allocation12_spill]]  ;;  %s2791_s4 = sld [smem:[#allocation14_spill]] }
 0x266   : > { %p1639_p9 = scmp.ge.s32.totalorder %s2004_s22, 2 }
 0x26b   : > { %s1327_s18 = sand.u32 1, %s2790_s23   ;;  %p2792_p11 = scmp.ne.s32.totalorder %s2791_s4, 0 }
 0x26c   : > { %s1328_s19 = scalar_lea.sflag [#allocation4], %s1327_s18 }
 0x26d   : > { %p1631_p0 = pnand %p1639_p9, %p2792_p11 }
 0x26f   : > { %1959 = dma.done.wait (!%p1631_p0), %s1328_s19, 2048  }
 0x270   : > { %1961 = vsyncadd (!%p1631_p0), %s1328_s19, 4294965248  ;;  %s20_s22 = sadd.s32 1, %s2004_s22   ;;  %s2793_s18 = sld [smem:[#allocation13_spill]] }
 0x271   : > { %p17_p5 = scmp.ge.s32.totalorder %s20_s22, 6   ;;  %s2794_s20 = sld [smem:[#allocation15_spill]] }
 0x272   : > { %s2795_s28 = smov %s2809_s15  ;;  %s2796_s12 = smov %s1968_s13 }
 0x273   : > { %s2797_s13 = smov %s1972_s14  ;;  %s2798_s14 = smov %s2220_s2 }
 0x274   : > { %s2799_s15 = smov %s1980_s16  ;;  %s2800_s16 = smov %s1984_s17 }
 0x275   : > { %s2801_s17 = smov %s2215_s10  ;;  %s2802_s19 = smov %s2000_s21 }
 0x276   : > { %s2803_s21 = smov %s2795_s28  ;;  %19 = sbr.rel (!%p17_p5) target bundleno = 13 (0xd), region = 88 }
 0x27d   :  { %1333 = vsyncpa [#allocation3], 1 }
 0x27e   :  { %1335 = vsyncpa [#allocation3 + $0x1], 1 }
 0x27f   :  { %1336 = vsyncpa [#allocation6], 1 }
 0x280   :  { %1337 = vsyncpa [#allocation4], 1 }
 0x281   :  { %1339 = vsyncpa [#allocation4 + $0x1], 1 }

</bundles_post_ra>
